<compile_context>
chip_gen: v5e
topology: v5e:2x2
jax: 0.10.0
libtpu: 0.0.40
codegen_flags: <defaults>
</compile_context>

<pallas_src>
import functools

import numpy as np
import jax
import jax.numpy as jnp
from jax.experimental import pallas as pl
from jax.experimental.pallas import tpu as pltpu


def _ceil_to(x, m):
    return (x + m - 1) // m * m


# ----------------------------------------------------------------------------
# pltpu.roll rotation-direction probe (cached per backend).  The kernel needs
# "shifted[p] = src[p + off]"; probe the XLU rotate direction once so tap
# shifts stay correct across jaxlib versions / backends.
# ----------------------------------------------------------------------------
@functools.lru_cache(maxsize=None)
def _roll_matches_jnp_for(backend: str) -> bool:
    del backend  # cache key only

    def probe(x_ref, o_ref):
        o_ref[...] = pltpu.roll(x_ref[...], 1, axis=1)

    with jax.ensure_compile_time_eval():
        x = jnp.arange(8 * 256, dtype=jnp.float32).reshape(8, 256)
        got = pl.pallas_call(
            probe, out_shape=jax.ShapeDtypeStruct((8, 256), jnp.float32))(x)
        return bool(jnp.array_equal(got, jnp.roll(x, 1, axis=1)))


def _roll_matches_jnp() -> bool:
    return _roll_matches_jnp_for(jax.default_backend())


# ----------------------------------------------------------------------------
# Fused kernel: one invocation per batch element.
#   x_ref     : (1, c0p, HW)            channel-padded input, lane-dense HW
#   mask_ref  : (9, HW)                 per-tap in-bounds masks
#   w{k}_ref  : (cout_pad_k, 9*cin_pad_k)  tap-fused conv weights
#   b{k}_ref  : (cout_pad_k, 1)         f32 biases
#   caw1/cab1/caw2t/cab2 : CA 1x1 convs as small matrices (f32)
#   o_ref     : (1, c_out, HW)
#   feat_ref  : VMEM scratch (9*(c0p+4*gcp), HW) -- pre-shifted feature stack
# ----------------------------------------------------------------------------
def _fused_dense_block_kernel(
        x_ref, mask_ref,
        w1_ref, w2_ref, w3_ref, w4_ref, w5_ref,
        b1_ref, b2_ref, b3_ref, b4_ref, b5_ref,
        caw1_ref, cab1_ref, caw2t_ref, cab2_ref,
        o_ref,
        feat_ref,
        *, H, W, c0p, gcp, neg_slope, feat_dtype, roll_jnp_like):
    HW = H * W

    seg_pad = (c0p, gcp, gcp, gcp, gcp)
    seg_off = []
    r = 0
    for p in seg_pad:
        seg_off.append(r)
        r += 9 * p
    total_rows = r

    # tap t = (oy+1)*3 + (ox+1);  flattened-HW shift = oy*W + ox
    taps = [((t // 3 - 1) * W + (t % 3 - 1), t) for t in range(9)]

    def append_segment(vals, off, pad):
        """Write the 9 pre-shifted, pre-masked tap copies of `vals` (pad, HW)
        into the stack at rows [off, off + 9*pad).  All offsets 8-aligned."""
        vals = vals.astype(feat_dtype)
        for sh, t in taps:
            if sh == 0:
                shifted = vals
            else:
                amt = (-sh) % HW if roll_jnp_like else sh % HW
                shifted = pltpu.roll(vals, amt, axis=1) * mask_ref[pl.ds(t, 1), :]
            feat_ref[pl.ds(off + t * pad, pad), :] = shifted

    # stage the (channel-padded) input as segment 0
    append_segment(x_ref[0], seg_off[0], c0p)

    def conv(prefix_rows, w_ref, b_ref, lrelu):
        """One fused 3x3 conv: single (cout_pad, K) @ (K, HW) MXU matmul."""
        acc = jnp.dot(w_ref[...], feat_ref[pl.ds(0, prefix_rows), :],
                      preferred_element_type=jnp.float32)
        acc = acc + b_ref[...]                          # (cout_pad, 1) broadcast
        if lrelu:
            acc = jnp.where(acc >= 0.0, acc, acc * neg_slope)
        return acc                                      # (cout_pad, HW) f32

    w_refs = (w1_ref, w2_ref, w3_ref, w4_ref)
    b_refs = (b1_ref, b2_ref, b3_ref, b4_ref)
    for k in range(4):
        y = conv(seg_off[k + 1], w_refs[k], b_refs[k], True)
        append_segment(y, seg_off[k + 1], gcp)

    x5 = conv(total_rows, w5_ref, b5_ref, False)        # (c_out, HW), f32

    # --- channel-attention epilogue (f32; x5 never leaves VMEM) --------------
    yv = jnp.sum(x5, axis=1, keepdims=True) * (1.0 / HW)                     # (Cout,1)
    h = jnp.sum(caw1_ref[...] * yv, axis=0, keepdims=True) + cab1_ref[...]   # (1,Cr)
    h = jnp.maximum(h, 0.0)
    s = jnp.sum(caw2t_ref[...] * h, axis=1, keepdims=True) + cab2_ref[...]   # (Cout,1)
    s = jax.nn.sigmoid(s)
    o_ref[0] = (x5 * s).astype(o_ref.dtype)


# ----------------------------------------------------------------------------
# Host-side prep helpers
# ----------------------------------------------------------------------------
def _fused_conv_weight(w_hwio, seg_bounds, seg_pads, cout_pad, dtype):
    """(3,3,cin_k,cout_k) HWIO -> (cout_pad, 9*sum(seg_pads)); K rows ordered
    (segment, tap, channel-within-segment); padded rows/channels are zero."""
    cout_k = w_hwio.shape[-1]
    parts = []
    for (lo, hi), pad in zip(seg_bounds, seg_pads):
        wj = jnp.transpose(w_hwio[:, :, lo:hi, :], (3, 0, 1, 2))  # (cout,3,3,nch)
        wj = jnp.pad(wj, ((0, cout_pad - cout_k), (0, 0), (0, 0),
                          (0, pad - (hi - lo))))
        parts.append(wj.reshape(cout_pad, 9 * pad))
    return jnp.concatenate(parts, axis=1).astype(dtype)


def _pad_bias(b, cout_pad):
    return jnp.pad(b, (0, cout_pad - b.shape[0])).reshape(cout_pad, 1).astype(
        jnp.float32)


def _tap_masks(H, W, dtype):
    HW = H * W
    pos = np.arange(HW)
    hh, ww = pos // W, pos % W
    m = np.zeros((9, HW), np.float32)
    for t in range(9):
        oy, ox = t // 3 - 1, t % 3 - 1
        m[t] = ((hh + oy >= 0) & (hh + oy < H) &
                (ww + ox >= 0) & (ww + ox < W)).astype(np.float32)
    return jnp.asarray(m, dtype)


def _whole_spec(a):
    ndim = a.ndim

    def idx(n):
        return (0,) * ndim

    return pl.BlockSpec(a.shape, idx)


def _pick_vmem_limit(needed_bytes):
    try:
        phys = int(pltpu.get_tpu_info().vmem_capacity_bytes)
    except Exception:  # conservative fallback: v7x per-TensorCore VMEM
        phys = 64 * 1024 * 1024
    hard_cap = max(phys - 16 * 1024 * 1024, phys // 2)
    want = max(2 * needed_bytes + 8 * 1024 * 1024, 32 * 1024 * 1024)
    return int(min(want, hard_cap))


# ----------------------------------------------------------------------------
# Full DenseBlock_CA_1 forward (public wrapper; NCHW in / NCHW out)
# ----------------------------------------------------------------------------
def dense_block_ca_1(x_nchw, params, use_bf16=False):
    """x_nchw: (N, Cin, H, W) float32 -> (N, Cout, H, W) float32."""
    N, c_in, H, W = x_nchw.shape
    HW = H * W
    gc = params["w1"].shape[-1]
    c_out = params["w5"].shape[-1]
    c_red = params["ca_w1"].shape[-1]

    c0p = _ceil_to(c_in, 8)
    gcp = _ceil_to(gc, 8)
    seg_pads = (c0p, gcp, gcp, gcp, gcp)
    total_rows = 9 * sum(seg_pads)
    feat_dtype = jnp.bfloat16 if use_bf16 else jnp.float32
    itemsize = 2 if use_bf16 else 4

    # channel bounds of each dense segment in the original concat ordering
    bounds = []
    lo = 0
    for ch in (c_in, gc, gc, gc, gc):
        bounds.append((lo, lo + ch))
        lo += ch

    # NCHW is already channel-major: flattening (H, W) puts H*W on the lanes.
    x_flat = x_nchw.reshape(N, c_in, HW)
    if c0p > c_in:
        x_flat = jnp.pad(x_flat, ((0, 0), (0, c0p - c_in), (0, 0)))
    x_flat = x_flat.astype(feat_dtype)

    mask = _tap_masks(H, W, feat_dtype)

    ws, bs = [], []
    for k in range(1, 6):
        cout_pad = c_out if k == 5 else gcp
        ws.append(_fused_conv_weight(params["w%d" % k], bounds[:k],
                                     seg_pads[:k], cout_pad, feat_dtype))
        bs.append(_pad_bias(params["b%d" % k], cout_pad))

    caw1 = params["ca_w1"].astype(jnp.float32)                 # (Cout, Cr)
    cab1 = params["ca_b1"].reshape(1, c_red).astype(jnp.float32)
    caw2t = params["ca_w2"].T.astype(jnp.float32)              # (Cout, Cr)
    cab2 = params["ca_b2"].reshape(c_out, 1).astype(jnp.float32)

    kernel = functools.partial(
        _fused_dense_block_kernel,
        H=H, W=W, c0p=c0p, gcp=gcp, neg_slope=0.2,
        feat_dtype=feat_dtype, roll_jnp_like=_roll_matches_jnp())

    operands = [x_flat, mask] + ws + bs + [caw1, cab1, caw2t, cab2]
    in_specs = [pl.BlockSpec((1, c0p, HW), lambda n: (n, 0, 0))]
    in_specs += [_whole_spec(a) for a in operands[1:]]

    needed = (total_rows * HW * itemsize                          # feature stack
              + 2 * (c0p * HW * itemsize + c_out * HW * 4)        # dbl-buffered i/o
              + sum(int(a.size) * a.dtype.itemsize for a in operands[1:]))

    out = pl.pallas_call(
        kernel,
        out_shape=jax.ShapeDtypeStruct((N, c_out, HW), jnp.float32),
        grid_spec=pltpu.PrefetchScalarGridSpec(
            num_scalar_prefetch=0,
            grid=(N,),
            in_specs=in_specs,
            out_specs=pl.BlockSpec((1, c_out, HW), lambda n: (n, 0, 0)),
            scratch_shapes=[pltpu.VMEM((total_rows, HW), feat_dtype)],
        ),
        compiler_params=pltpu.CompilerParams(
            dimension_semantics=("parallel",),
            vmem_limit_bytes=_pick_vmem_limit(needed),
        ),
    )(*operands)

    return out.reshape(N, c_out, H, W)


# ----------------------------------------------------------------------------
# Pure-JAX reference (correctness check)
# ----------------------------------------------------------------------------
def _ref_conv3x3(x, w, b, neg_slope=None):
    y = jax.lax.conv_general_dilated(
        x, w, window_strides=(1, 1), padding="SAME",
        dimension_numbers=("NHWC", "HWIO", "NHWC"))
    y = y + b[None, None, None, :]
    if neg_slope is not None:
        y = jnp.where(y >= 0.0, y, y * neg_slope)
    return y


def _ref_forward(x_nchw, p):
    x = jnp.transpose(x_nchw, (0, 2, 3, 1))
    x1 = _ref_conv3x3(x, p["w1"], p["b1"], 0.2)
    x2 = _ref_conv3x3(jnp.concatenate([x, x1], -1), p["w2"], p["b2"], 0.2)
    x3 = _ref_conv3x3(jnp.concatenate([x, x1, x2], -1), p["w3"], p["b3"], 0.2)
    x4 = _ref_conv3x3(jnp.concatenate([x, x1, x2, x3], -1), p["w4"], p["b4"], 0.2)
    x5 = _ref_conv3x3(jnp.concatenate([x, x1, x2, x3, x4], -1), p["w5"], p["b5"], None)
    y = jnp.mean(x5, axis=(1, 2))                                   # (N, C)
    h = jnp.maximum(y @ p["ca_w1"] + p["ca_b1"], 0.0)
    s = jax.nn.sigmoid(h @ p["ca_w2"] + p["ca_b2"])
    x5 = x5 * s[:, None, None, :]
    return jnp.transpose(x5, (0, 3, 1, 2))


# ----------------------------------------------------------------------------
# Deterministic parameter init (synthetic; mirrors the PyTorch module shapes)
# ----------------------------------------------------------------------------
def make_params(key, channel_in, channel_out, gc):
    ks = jax.random.split(key, 16)

    def conv_w(k, cin, cout, scale=0.1):
        return scale * jax.random.normal(k, (3, 3, cin, cout), jnp.float32)

    def vec(k, c, scale=0.05):
        return scale * jax.random.normal(k, (c,), jnp.float32)

    cr = channel_out // 2  # CALayer reduction = 2
    return {
        "w1": conv_w(ks[0], channel_in, gc),            "b1": vec(ks[1], gc),
        "w2": conv_w(ks[2], channel_in + gc, gc),       "b2": vec(ks[3], gc),
        "w3": conv_w(ks[4], channel_in + 2 * gc, gc),   "b3": vec(ks[5], gc),
        "w4": conv_w(ks[6], channel_in + 3 * gc, gc),   "b4": vec(ks[7], gc),
        "w5": conv_w(ks[8], channel_in + 4 * gc, channel_out),
        "b5": vec(ks[9], channel_out),
        # CALayer 1x1 convs represented as (Cin, Cout) matmul weights
        "ca_w1": 0.1 * jax.random.normal(ks[10], (channel_out, cr), jnp.float32),
        "ca_b1": vec(ks[11], cr),
        "ca_w2": 0.1 * jax.random.normal(ks[12], (cr, channel_out), jnp.float32),
        "ca_b2": vec(ks[13], channel_out),
    }


if __name__ == "__main__":
    key = jax.random.PRNGKey(0)
    k_x, k_p = jax.random.split(key)

    N, C_IN, C_OUT, GC, H, W = 2, 4, 4, 8, 16, 16
    x = jax.random.normal(k_x, (N, C_IN, H, W), jnp.float32)
    params = make_params(k_p, C_IN, C_OUT, GC)

    # resolve the pltpu.roll direction probe eagerly on this backend
    _roll_matches_jnp()

    ref = jax.block_until_ready(_ref_forward(x, params))

    # exact f32 path
    fwd = jax.jit(functools.partial(dense_block_ca_1, use_bf16=False))
    out = jax.block_until_ready(fwd(x, params))
    assert out.shape == (N, C_OUT, H, W), out.shape
    assert jnp.allclose(out, ref, atol=2e-4, rtol=2e-4), (
        float(jnp.max(jnp.abs(out - ref))))

    # bf16 MXU path (v6e/v7x): loose-tolerance sanity check
    fwd_bf16 = jax.jit(functools.partial(dense_block_ca_1, use_bf16=True))
    out_bf16 = jax.block_until_ready(fwd_bf16(x, params))
    assert jnp.allclose(out_bf16, ref, atol=2e-1, rtol=2e-1), (
        float(jnp.max(jnp.abs(out_bf16 - ref))))

    print("KERNEL_OK")
</pallas_src>

<mosaic_0001>
module attributes {stable_mosaic.version = 11 : i64} {
  func.func @probe(%arg0: memref<8x256xf32, #tpu.memory_space<vmem>>, %arg1: memref<8x256xf32, #tpu.memory_space<vmem>>) attributes {dimension_semantics = [], scalar_prefetch = 0 : i64, scratch_operands = 0 : i64, tpu.core_type = #tpu.core_type<tc>} {
    %c0 = arith.constant 0 : index
    %c0_0 = arith.constant 0 : index
    %0 = vector.load %arg0[%c0, %c0_0] : memref<8x256xf32, #tpu.memory_space<vmem>>, vector<8x256xf32>
    %c1_i32 = arith.constant 1 : i32
    %1 = tpu.dynamic_rotate %0 by %c1_i32 dim 1 : vector<8x256xf32>, i32 -> vector<8x256xf32>
    %c0_1 = arith.constant 0 : index
    %c0_2 = arith.constant 0 : index
    %2 = vector.load %arg1[%c0_1, %c0_2] : memref<8x256xf32, #tpu.memory_space<vmem>>, vector<8x256xf32>
    tpu.vector_store %arg1[%c0_1, %c0_2], %1 {strides = array<i32>} : memref<8x256xf32, #tpu.memory_space<vmem>>, vector<8x256xf32>,
    return
  }
}

</mosaic_0001>

<bundles_post_ra>
// kernel: tpu_custom_call.1
= control target key start
LH: loop header
LB: loop body
LE: loop exit
PB: predicated region body
PF: predicated region fallthrough
CT: control target
= control target key end

     0   :  { %6 = vsyncpa [#allocation3], 0  ;;  %s127_s0 = inlined_call_operand.hbm [shape: f32[8,256], index: 0, kind: input, shape index: {}]   ;;  %s128_s1 = inlined_call_operand.hbm [shape: f32[8,256], index: 1, kind: output, shape index: {}]  }
   0x1   :  { %7 = vsyncpa [#allocation4], 0  ;;  %s13_s8 = sshll.u32 %s127_s0, 4  ;;  %s108_s9 = smov [#allocation2]   ;;  %s14_s8 = int_to_ptr.hbm [resolvable:$true] %s13_s8 }
   0x2   :  { %s15_s10 = sshll.u32 %s108_s9, 4  ;;  %s16_s10 = int_to_ptr.vmem [resolvable:$true] %s15_s10 }
   0x3   :  { %18 = dma.hbm_to_vmem [thread:$0]  %s14_s8, 256, %s16_s10, [#allocation3]  }
   0x4   :  { %104 = dma.done.wait [#allocation3], 256  }
   0x5   :  { %105 = vsyncadd [#allocation3], 4294967040  ;;  %v23_v0 = vld [vmem:[#allocation2] sm:$0xff]  ;;  %s109_s11 = smov 1   ;;  %v24_v1 = vld [vmem:[#allocation2 + $0x8] sm:$0xff]  ;;  %v29_v2 = vlaneseq  ;;  %s110_s12 = smov [#allocation5]  }
   0x6   :  { %25 = vrot.lane.b32.xlu0 %v23_v0, %s109_s11  ;;  %s41_s13 = sshll.u32 %s110_s12, 4  ;;  %s43_s15 = sshll.u32 %s128_s1, 4  ;;  %s42_s13 = int_to_ptr.vmem [resolvable:$true] %s41_s13  ;;  %s44_s15 = int_to_ptr.hbm [resolvable:$true] %s43_s15 }
   0x7   :  { %v30_v4 = vand.u32 127, %v29_v2 }
   0x9   :  { %vm31_vm0 = vcmp.lt.s32.totalorder %v30_v4, 1 }
   0xe   :  { %27 = vrot.lane.b32.xlu0 %v24_v1, %s109_s11 }
  0x78   :  { %v26_v3 = vpop.permute.xlu0 %25 }
  0x80   :  { %v28_v5 = vpop.permute.xlu0 %27 }
  0x81   :  { %v32_v6 = vsel %vm31_vm0, %v26_v3, %v28_v5  ;;  %v33_v7 = vsel %vm31_vm0, %v28_v5, %v26_v3 }
  0x82   :  { %34 = vst [vmem:[#allocation5] sm:$0xff] %v33_v7 }
  0x83   :  { %35 = vst [vmem:[#allocation5 + $0x8] sm:$0xff] %v32_v6 }
  0x84   :  { %46 = dma.vmem_to_hbm [thread:$0]  %s42_s13, 256, %s44_s15, [#allocation4]  }
  0x85   :  { %106 = dma.done.wait [#allocation4], 256  }
  0x86   :  { %107 = vsyncadd [#allocation4], 4294967040 }
  0x87   :  { %51 = vsyncpa [#allocation3], 1 }
  0x88   :  { %52 = vsyncpa [#allocation4], 1 }

</bundles_post_ra>
